<compile_context>
chip_gen: v6e
topology: v6e:2x2x1
jax: 0.10.0
libtpu: 0.0.40
codegen_flags: <defaults>
</compile_context>

<pallas_src>
import functools

import jax
import jax.numpy as jnp
from jax.experimental import pallas as pl
from jax.experimental.pallas import tpu as pltpu

NEG_SLOPE = 0.01      # torch.nn.functional.leaky_relu default negative_slope
LANE = 128            # TPU lane width -> lane-dense feature padding
SUBLANE = 8           # f32 sublane packing for the batch axis
BATCH_TILE = 256      # batch tile when the batch is large enough to pipeline


def _round_up(n, m):
    return ((n + m - 1) // m) * m


def _mlp_kernel(num_layers, *refs):
    """refs = (x_ref, w0_ref, b0_ref, w1_ref, b1_ref, ..., o_ref).

    All operands are already lane/sublane padded; padded rows/cols of the
    weights and biases are zero so they contribute nothing to the result.
    """
    x_ref = refs[0]
    o_ref = refs[-1]
    param_refs = refs[1:-1]

    h = x_ref[...].astype(jnp.float32)
    for i in range(num_layers):
        w = param_refs[2 * i][...]        # (in_pad_i, out_pad_i)
        b = param_refs[2 * i + 1][...]    # (1, out_pad_i)
        h = jnp.dot(h, w, preferred_element_type=jnp.float32) + b
        if i < num_layers - 1:            # leaky_relu between layers, not after last
            h = jnp.where(h > 0, h, NEG_SLOPE * h)
    o_ref[...] = h.astype(o_ref.dtype)


def prepare_params(params):
    """One-time glue: transpose to (in, out), reshape bias to (1, out), and
    zero-pad every feature dim up to a multiple of 128 lanes."""
    padded = []
    for (w, b) in params:                 # w: (out, in)  b: (out,)
        fan_out, fan_in = w.shape
        in_pad = _round_up(fan_in, LANE)
        out_pad = _round_up(fan_out, LANE)
        wt = jnp.zeros((in_pad, out_pad), jnp.float32).at[:fan_in, :fan_out].set(w.T)
        b2 = jnp.zeros((1, out_pad), jnp.float32).at[0, :fan_out].set(b)
        padded.append((wt, b2))
    return padded


def _padded_forward(x_pad, padded_params):
    """Runs the whole padded MLP in one pallas_call. x_pad: (B_pad, in_pad)."""
    num_layers = len(padded_params)
    b_pad, _ = x_pad.shape
    out_pad = padded_params[-1][0].shape[1]
    kernel = functools.partial(_mlp_kernel, num_layers)

    args = [x_pad]
    for (w, b) in padded_params:
        args.append(w)
        args.append(b)

    if b_pad <= BATCH_TILE:
        # Single invocation, no grid: whole arrays resident in VMEM, no
        # per-grid-step bookkeeping.
        vmem_spec = pl.BlockSpec(memory_space=pltpu.MemorySpace.VMEM)
        return pl.pallas_call(
            kernel,
            out_shape=jax.ShapeDtypeStruct((b_pad, out_pad), x_pad.dtype),
            in_specs=[vmem_spec] * len(args),
            out_specs=pl.BlockSpec(memory_space=pltpu.MemorySpace.VMEM),
        )(*args)

    # Large batch: tile the batch axis so BlockSpec double-buffers the
    # activation stream; weights/biases stay resident via index_map (0, 0).
    grid = (b_pad // BATCH_TILE,)
    in_specs = [pl.BlockSpec((BATCH_TILE, x_pad.shape[1]), lambda i: (i, 0))]
    for (w, b) in padded_params:
        in_specs.append(pl.BlockSpec(w.shape, lambda i: (0, 0)))
        in_specs.append(pl.BlockSpec(b.shape, lambda i: (0, 0)))
    return pl.pallas_call(
        kernel,
        out_shape=jax.ShapeDtypeStruct((b_pad, out_pad), x_pad.dtype),
        grid=grid,
        in_specs=in_specs,
        out_specs=pl.BlockSpec((BATCH_TILE, out_pad), lambda i: (i, 0)),
        compiler_params=pltpu.CompilerParams(
            dimension_semantics=("parallel",)),
    )(*args)
    # TODO(synk): for very large hidden sizes, also tile the K/N dims and cap
    # vmem_limit_bytes (v7x has only 64 MiB VMEM); irrelevant at DQN sizes.


@functools.partial(jax.jit, static_argnames=("out_dim",))
def mlp_forward(x, padded_params, out_dim):
    """NN.forward equivalent.  x: (B, in_dim), padded_params from prepare_params."""
    batch, in_dim = x.shape
    in_pad = padded_params[0][0].shape[0]
    if batch > BATCH_TILE:
        b_pad = _round_up(batch, BATCH_TILE)
    else:
        b_pad = _round_up(batch, SUBLANE)
    x_pad = jnp.zeros((b_pad, in_pad), x.dtype).at[:batch, :in_dim].set(x)
    out_padded = _padded_forward(x_pad, padded_params)
    return out_padded[:batch, :out_dim]


def init_params(key, in_size, out_size, layers):
    """Deterministic PyTorch-style init: U(-1/sqrt(fan_in), 1/sqrt(fan_in))."""
    sizes = [in_size] + list(layers) + [out_size]
    params = []
    for i in range(len(sizes) - 1):
        fan_in, fan_out = sizes[i], sizes[i + 1]
        key, kw, kb = jax.random.split(key, 3)
        bound = 1.0 / (fan_in ** 0.5)
        w = jax.random.uniform(kw, (fan_out, fan_in), jnp.float32, -bound, bound)
        b = jax.random.uniform(kb, (fan_out,), jnp.float32, -bound, bound)
        params.append((w, b))
    return params


def reference_forward(x, params):
    """Pure-JAX reference matching the PyTorch module semantics."""
    h = x
    for i, (w, b) in enumerate(params):
        if i > 0:
            h = jnp.where(h > 0, h, NEG_SLOPE * h)
        h = h @ w.T + b
    return h


if __name__ == "__main__":
    # DQN-Cartpole sizes: state dim 4, 2 actions, one hidden layer of 32.
    in_size, out_size, hidden_layers = 4, 2, [32]

    key = jax.random.PRNGKey(0)
    key, kx = jax.random.split(key)
    params = init_params(key, in_size, out_size, hidden_layers)
    padded_params = prepare_params(params)   # done once, not per call

    # Small batch: grid-less, fully VMEM-resident path.
    batch = 8
    x = jax.random.normal(kx, (batch, in_size), dtype=jnp.float32)
    out = mlp_forward(x, padded_params, out_size)
    out = jax.block_until_ready(out)
    ref = reference_forward(x, params)
    assert out.shape == (batch, out_size)
    assert jnp.allclose(out, ref, atol=1e-4, rtol=1e-4), "mismatch vs reference (small batch)"

    # Large batch: exercises the batch-tiled, parallel-grid path.
    key, kx2 = jax.random.split(key)
    big_batch = 300
    x_big = jax.random.normal(kx2, (big_batch, in_size), dtype=jnp.float32)
    out_big = mlp_forward(x_big, padded_params, out_size)
    out_big = jax.block_until_ready(out_big)
    ref_big = reference_forward(x_big, params)
    assert out_big.shape == (big_batch, out_size)
    assert jnp.allclose(out_big, ref_big, atol=1e-4, rtol=1e-4), "mismatch vs reference (big batch)"

    print("KERNEL_OK")
</pallas_src>

<mosaic_0001>
module attributes {stable_mosaic.version = 11 : i64} {
  func.func @_mlp_kernel(%arg0: memref<8x128xf32, #tpu.memory_space<vmem>>, %arg1: memref<128x128xf32, #tpu.memory_space<vmem>>, %arg2: memref<1x128xf32, #tpu.memory_space<vmem>>, %arg3: memref<128x128xf32, #tpu.memory_space<vmem>>, %arg4: memref<1x128xf32, #tpu.memory_space<vmem>>, %arg5: memref<8x128xf32, #tpu.memory_space<vmem>>) attributes {dimension_semantics = [], scalar_prefetch = 0 : i64, scratch_operands = 0 : i64, tpu.core_type = #tpu.core_type<tc>} {
    %c0 = arith.constant 0 : index
    %c0_0 = arith.constant 0 : index
    %0 = vector.load %arg0[%c0, %c0_0] : memref<8x128xf32, #tpu.memory_space<vmem>>, vector<8x128xf32>
    %c0_1 = arith.constant 0 : index
    %c0_2 = arith.constant 0 : index
    %1 = vector.load %arg1[%c0_1, %c0_2] : memref<128x128xf32, #tpu.memory_space<vmem>>, vector<128x128xf32>
    %c0_3 = arith.constant 0 : index
    %c0_4 = arith.constant 0 : index
    %2 = vector.load %arg2[%c0_3, %c0_4] : memref<1x128xf32, #tpu.memory_space<vmem>>, vector<1x128xf32>
    %cst = arith.constant dense<0.000000e+00> : vector<8x128xf32>
    %3 = tpu.matmul %0, %1, %cst {dimension_numbers = #tpu.dot_dimension_numbers<[1], [0], [0], [1], [0, 0, 1, 1], [], []>} : vector<8x128xf32>, vector<128x128xf32>, vector<8x128xf32> -> vector<8x128xf32>
    %4 = vector.broadcast %2 : vector<1x128xf32> to vector<8x128xf32>
    %5 = arith.addf %3, %4 : vector<8x128xf32>
    %cst_5 = arith.constant 0.000000e+00 : f32
    %6 = vector.broadcast %cst_5 : f32 to vector<8x128xf32>
    %7 = arith.cmpf ogt, %5, %6 : vector<8x128xf32>
    %cst_6 = arith.constant 0.00999999977 : f32
    %8 = vector.broadcast %cst_6 : f32 to vector<8x128xf32>
    %9 = arith.mulf %8, %5 : vector<8x128xf32>
    %10 = arith.select %7, %5, %9 : vector<8x128xi1>, vector<8x128xf32>
    %c0_7 = arith.constant 0 : index
    %c0_8 = arith.constant 0 : index
    %11 = vector.load %arg3[%c0_7, %c0_8] : memref<128x128xf32, #tpu.memory_space<vmem>>, vector<128x128xf32>
    %c0_9 = arith.constant 0 : index
    %c0_10 = arith.constant 0 : index
    %12 = vector.load %arg4[%c0_9, %c0_10] : memref<1x128xf32, #tpu.memory_space<vmem>>, vector<1x128xf32>
    %cst_11 = arith.constant dense<0.000000e+00> : vector<8x128xf32>
    %13 = tpu.matmul %10, %11, %cst_11 {dimension_numbers = #tpu.dot_dimension_numbers<[1], [0], [0], [1], [0, 0, 1, 1], [], []>} : vector<8x128xf32>, vector<128x128xf32>, vector<8x128xf32> -> vector<8x128xf32>
    %14 = vector.broadcast %12 : vector<1x128xf32> to vector<8x128xf32>
    %15 = arith.addf %13, %14 : vector<8x128xf32>
    %c0_12 = arith.constant 0 : index
    %c0_13 = arith.constant 0 : index
    %16 = vector.load %arg5[%c0_12, %c0_13] : memref<8x128xf32, #tpu.memory_space<vmem>>, vector<8x128xf32>
    tpu.vector_store %arg5[%c0_12, %c0_13], %15 {strides = array<i32>} : memref<8x128xf32, #tpu.memory_space<vmem>>, vector<8x128xf32>,
    return
  }
}

</mosaic_0001>

<bundles_post_ra>
// kernel: mlp_forward.1
= control target key start
LH: loop header
LB: loop body
LE: loop exit
PB: predicated region body
PF: predicated region fallthrough
CT: control target
= control target key end

     0   :  { %10 = vsyncpa [#allocation3], 0  ;;  %s489_s0 = inlined_call_operand.vmem [shape: f32[8,128], index: 0, kind: input, shape index: {}]   ;;  %s490_s1 = inlined_call_operand.hbm [shape: f32[128,128], index: 1, kind: input, shape index: {}]   ;;  %s491_s2 = inlined_call_operand.vmem [shape: f32[1,128], index: 2, kind: input, shape index: {}]   ;;  %s492_s3 = inlined_call_operand.hbm [shape: f32[128,128], index: 3, kind: input, shape index: {}]   ;;  %s493_s4 = inlined_call_operand.vmem [shape: f32[1,128], index: 4, kind: input, shape index: {}]   ;;  %s494_s5 = inlined_call_operand.vmem [shape: f32[8,128], index: 5, kind: output, shape index: {}]  }
   0x1   :  { %11 = vsyncpa [#allocation5], 0  ;;  %s401_s18 = smov [#allocation2]  }
   0x2   :  { %s19_s19 = sshll.u32 %s401_s18, 4  ;;  %s20_s19 = int_to_ptr.vmem [resolvable:$true] %s19_s19 }
   0x3   :  { %s365_s20 = scalar_lea.vmem %s20_s19, 2048  ;;  %p370_p1 = scmp.lt.s32.totalorder %s20_s19, %s20_s19 }
   0x4   :  { %p366_p0 = scmp.ne.s32.totalorder %s20_s19, %s365_s20  ;;  %p371_p2 = scmp.lt.s32.totalorder %s365_s20, %s365_s20 }
   0x6   :  { %p372_p3 = por %p371_p2, %p370_p1 }
   0x8   :  { %p373_p4 = pnand %p372_p3, %p366_p0 }
   0xa   :  { %376 = shalt.err (!%p373_p4)
}
   0xb   :  { %s402_s21 = smov 128   ;;  %s403_s22 = smov 8  }
   0xc   :  { %25 = dma.hbm_to_vmem [thread:$0]  %s490_s1, 2048, %s20_s19, [#allocation3], %s402_s21, %s402_s21, %s403_s22  }
   0xd   :  { %s404_s25 = smov [#allocation4]  }
   0xe   :  { %s33_s26 = sshll.u32 %s404_s25, 4  ;;  %s34_s26 = int_to_ptr.vmem [resolvable:$true] %s33_s26 }
   0xf   :  { %s385_s27 = scalar_lea.vmem %s34_s26, 2048  ;;  %p390_p6 = scmp.lt.s32.totalorder %s34_s26, %s34_s26 }
  0x10   :  { %p386_p5 = scmp.ne.s32.totalorder %s34_s26, %s385_s27  ;;  %p391_p7 = scmp.lt.s32.totalorder %s385_s27, %s385_s27 }
  0x12   :  { %p392_p8 = por %p391_p7, %p390_p6 }
  0x14   :  { %p393_p9 = pnand %p392_p8, %p386_p5 }
  0x16   :  { %396 = shalt.err (!%p393_p9)
}
  0x17   :  { %39 = dma.hbm_to_vmem [thread:$0]  %s492_s3, 2048, %s34_s26, [#allocation5], %s402_s21, %s402_s21, %s403_s22  }
  0x18   :  { %397 = dma.done.wait [#allocation3], 2048  }
  0x19   :  { %398 = vsyncadd [#allocation3], 4294965248 }
  0x1a   :  { %399 = dma.done.wait [#allocation5], 2048  }
  0x1b   :  { %400 = vsyncadd [#allocation5], 4294965248  ;;  %v405_v0 = vmov 0.0   ;;  %vm406_vm0 = vmmov 0   ;;  %v64_v1 = vld [vmem:[#allocation2 + $0x78] sm:$0xff]  ;;  %v63_v2 = vld [vmem:[#allocation2 + $0x70] sm:$0xff] }
  0x1c   :  { %281 = vmatprep.subr.mxu0 %v405_v0  ;;  %313 = vmatprep.mubr.msk.f32.mxu0 %vm406_vm0, %v405_v0  ;;  %v62_v3 = vld [vmem:[#allocation2 + $0x68] sm:$0xff]  ;;  %v61_v4 = vld [vmem:[#allocation2 + $0x60] sm:$0xff]  ;;  %v160_v5 = vld [vmem:[#allocation4 + $0x78] sm:$0xff] }
  0x1d   :  { %316 = vmatprep.subr.mxu1 %v405_v0  ;;  %348 = vmatprep.mubr.msk.f32.mxu1 %vm406_vm0, %v405_v0  ;;  %v60_v6 = vld [vmem:[#allocation2 + $0x58] sm:$0xff]  ;;  %v159_v7 = vld [vmem:[#allocation4 + $0x70] sm:$0xff]  ;;  %v158_v8 = vld [vmem:[#allocation4 + $0x68] sm:$0xff] }
  0x1e   :  { %282 = vmatpush3.msra.mxu0 %v64_v1  ;;  %317 = vmatpush3.msra.mxu1 %v160_v5  ;;  %v59_v9 = vld [vmem:[#allocation2 + $0x50] sm:$0xff]  ;;  %v157_v10 = vld [vmem:[#allocation4 + $0x60] sm:$0xff]  ;;  %v58_v11 = vld [vmem:[#allocation2 + $0x48] sm:$0xff] }
  0x1f   :  { %283 = vmatprep.subr.mxu0 %v405_v0  ;;  %318 = vmatprep.subr.mxu1 %v405_v0  ;;  %v156_v12 = vld [vmem:[#allocation4 + $0x58] sm:$0xff]  ;;  %v57_v13 = vld [vmem:[#allocation2 + $0x40] sm:$0xff]  ;;  %v155_v14 = vld [vmem:[#allocation4 + $0x50] sm:$0xff] }
  0x20   :  { %284 = vmatpush3.msra.mxu0 %v63_v2  ;;  %319 = vmatpush3.msra.mxu1 %v159_v7  ;;  %v56_v15 = vld [vmem:[#allocation2 + $0x38] sm:$0xff]  ;;  %v154_v16 = vld [vmem:[#allocation4 + $0x48] sm:$0xff]  ;;  %v55_v17 = vld [vmem:[#allocation2 + $0x30] sm:$0xff] }
  0x21   :  { %285 = vmatprep.subr.mxu0 %v405_v0  ;;  %320 = vmatprep.subr.mxu1 %v405_v0  ;;  %v153_v18 = vld [vmem:[#allocation4 + $0x40] sm:$0xff]  ;;  %v54_v19 = vld [vmem:[#allocation2 + $0x28] sm:$0xff]  ;;  %v152_v20 = vld [vmem:[#allocation4 + $0x38] sm:$0xff] }
  0x22   :  { %286 = vmatpush3.msra.mxu0 %v62_v3  ;;  %321 = vmatpush3.msra.mxu1 %v158_v8  ;;  %v53_v21 = vld [vmem:[#allocation2 + $0x20] sm:$0xff]  ;;  %v151_v22 = vld [vmem:[#allocation4 + $0x30] sm:$0xff]  ;;  %v52_v23 = vld [vmem:[#allocation2 + $0x18] sm:$0xff] }
  0x23   :  { %287 = vmatprep.subr.mxu0 %v405_v0  ;;  %322 = vmatprep.subr.mxu1 %v405_v0  ;;  %v150_v24 = vld [vmem:[#allocation4 + $0x28] sm:$0xff]  ;;  %v51_v25 = vld [vmem:[#allocation2 + $0x10] sm:$0xff]  ;;  %v149_v26 = vld [vmem:[#allocation4 + $0x20] sm:$0xff] }
  0x24   :  { %288 = vmatpush3.msra.mxu0 %v61_v4  ;;  %323 = vmatpush3.msra.mxu1 %v157_v10  ;;  %v50_v27 = vld [vmem:[#allocation2 + $0x8] sm:$0xff]  ;;  %v148_v28 = vld [vmem:[#allocation4 + $0x18] sm:$0xff]  ;;  %v49_v29 = vld [vmem:[#allocation2] sm:$0xff] }
  0x25   :  { %289 = vmatprep.subr.mxu0 %v405_v0  ;;  %324 = vmatprep.subr.mxu1 %v405_v0  ;;  %v48_v30 = vld [vmem:[%s489_s0] sm:$0xff]  ;;  %v147_v31 = vld [vmem:[#allocation4 + $0x10] sm:$0xff]  ;;  %v146_v32 = vld [vmem:[#allocation4 + $0x8] sm:$0xff] }
  0x26   :  { %290 = vmatpush3.msra.mxu0 %v60_v6  ;;  %325 = vmatpush3.msra.mxu1 %v156_v12  ;;  %v145_v33 = vld [vmem:[#allocation4] sm:$0xff] }
  0x27   :  { %291 = vmatprep.subr.mxu0 %v405_v0  ;;  %326 = vmatprep.subr.mxu1 %v405_v0  ;;  %v245_v34 = vld [vmem:[%s491_s2] ss:$0 sm:$0xff] }
  0x28   :  { %292 = vmatpush3.msra.mxu0 %v59_v9  ;;  %327 = vmatpush3.msra.mxu1 %v155_v14  ;;  %v246_v40 = vld [vmem:[%s493_s4] ss:$0 sm:$0xff] }
  0x29   :  { %293 = vmatprep.subr.mxu0 %v405_v0  ;;  %328 = vmatprep.subr.mxu1 %v405_v0 }
  0x2a   :  { %294 = vmatpush3.msra.mxu0 %v58_v11  ;;  %329 = vmatpush3.msra.mxu1 %v154_v16 }
  0x2b   :  { %295 = vmatprep.subr.mxu0 %v405_v0  ;;  %330 = vmatprep.subr.mxu1 %v405_v0 }
  0x2c   :  { %296 = vmatpush3.msra.mxu0 %v57_v13  ;;  %331 = vmatpush3.msra.mxu1 %v153_v18 }
  0x2d   :  { %297 = vmatprep.subr.mxu0 %v405_v0  ;;  %332 = vmatprep.subr.mxu1 %v405_v0 }
  0x2e   :  { %298 = vmatpush3.msra.mxu0 %v56_v15  ;;  %333 = vmatpush3.msra.mxu1 %v152_v20 }
  0x2f   :  { %299 = vmatprep.subr.mxu0 %v405_v0  ;;  %334 = vmatprep.subr.mxu1 %v405_v0 }
  0x30   :  { %300 = vmatpush3.msra.mxu0 %v55_v17  ;;  %335 = vmatpush3.msra.mxu1 %v151_v22 }
  0x31   :  { %301 = vmatprep.subr.mxu0 %v405_v0  ;;  %336 = vmatprep.subr.mxu1 %v405_v0 }
  0x32   :  { %302 = vmatpush3.msra.mxu0 %v54_v19  ;;  %337 = vmatpush3.msra.mxu1 %v150_v24 }
  0x33   :  { %303 = vmatprep.subr.mxu0 %v405_v0  ;;  %338 = vmatprep.subr.mxu1 %v405_v0 }
  0x34   :  { %304 = vmatpush3.msra.mxu0 %v53_v21  ;;  %339 = vmatpush3.msra.mxu1 %v149_v26 }
  0x35   :  { %305 = vmatprep.subr.mxu0 %v405_v0  ;;  %340 = vmatprep.subr.mxu1 %v405_v0 }
  0x36   :  { %306 = vmatpush3.msra.mxu0 %v52_v23  ;;  %341 = vmatpush3.msra.mxu1 %v148_v28 }
  0x37   :  { %307 = vmatprep.subr.mxu0 %v405_v0  ;;  %342 = vmatprep.subr.mxu1 %v405_v0 }
  0x38   :  { %308 = vmatpush3.msra.mxu0 %v51_v25  ;;  %343 = vmatpush3.msra.mxu1 %v147_v31 }
  0x39   :  { %309 = vmatprep.subr.mxu0 %v405_v0  ;;  %344 = vmatprep.subr.mxu1 %v405_v0 }
  0x3a   :  { %310 = vmatpush3.msra.mxu0 %v50_v27  ;;  %345 = vmatpush3.msra.mxu1 %v146_v32 }
  0x3b   :  { %311 = vmatprep.subr.mxu0 %v405_v0  ;;  %346 = vmatprep.subr.mxu1 %v405_v0 }
  0x3c   :  { %312 = vmatpush3.msra.mxu0 %v49_v29  ;;  %347 = vmatpush3.msra.mxu1 %v145_v33 }
  0x3d   :  { %314 = vmatmul.mubr.f32.vlgmr.msra.gmra.mxu0 %v48_v30 }
  0xfd   :  { %v138_v35 = vpop.f32.mrf.mxu0 }
  0xfe   :  { %v139_v36 = vadd.f32 %v245_v34, %v138_v35 }
  0xff   :  { %v315_v37 = vpop.f32.mrf.mxu0 }
 0x100   :  { %v143_v38 = vmul.f32 0.01, %v139_v36  ;;  %vm142_vm1 = vcmp.gt.f32.partialorder %v139_v36, 0.0 }
 0x102   :  { %v144_v39 = vsel %vm142_vm1, %v139_v36, %v143_v38 }
 0x103   :  { %349 = vmatmul.mubr.f32.vlgmr.msra.gmra.mxu1 %v144_v39 }
 0x1c3   :  { %v234_v41 = vpop.f32.mrf.mxu1 }
 0x1c4   :  { %v235_v42 = vadd.f32 %v246_v40, %v234_v41 }
 0x1c5   :  { %v350_v43 = vpop.f32.mrf.mxu1 }
 0x1c6   :  { %238 = vst [vmem:[%s494_s5] sm:$0xff] %v235_v42 }
 0x1c7   :  { %243 = vsyncpa [#allocation3], 1 }
 0x1c8   :  { %244 = vsyncpa [#allocation5], 1 }

</bundles_post_ra>
